<compile_context>
chip_gen: v7x
topology: tpu7x:2x2x1
jax: 0.10.0
libtpu: 0.0.40
codegen_flags: <defaults>
</compile_context>

<pallas_src>
import functools

import jax
import jax.numpy as jnp
from jax.experimental import pallas as pl
from jax.experimental.pallas import tpu as pltpu


def _shortcut_kernel(x_ref, o_ref, *, stride, pad, h_s, w_s):
    # x_ref: (n_blk, C, H, W)   o_ref: (n_blk, C_out, H_s * W_s)
    nb, c, h, w = x_ref.shape
    x = x_ref[...]                                              # one full load

    if stride > 1:
        hp, wp = h_s * stride, w_s * stride
        if (hp, wp) != (h, w):
            # Only hit when H or W is not a multiple of stride (ceil semantics).
            x = jnp.pad(x, ((0, 0), (0, 0), (0, hp - h), (0, wp - w)))
        # W subsample: split lane dim into (W_s, stride), keep phase 0.
        x = x.reshape(nb, c, hp, w_s, stride)[..., 0]           # (nb, C, Hp, W_s)
        # H subsample: split sublane dim into (H_s, stride), keep phase 0.
        x = x.reshape(nb, c, h_s, stride, w_s)[:, :, :, 0, :]   # (nb, C, H_s, W_s)

    sub = x.reshape(nb, c, h_s * w_s)            # lane-dense flat spatial
    out = jnp.pad(sub, ((0, 0), (pad, pad), (0, 0))) if pad > 0 else sub
    o_ref[...] = out                             # single full-width store


def _pick_batch_block(n, per_image_bytes, budget_bytes=2 * 1024 * 1024):
    """Largest divisor of n whose (in+out) tile fits the budget, keeping >=2
    grid steps when n >= 2 (feeds both v7x TensorCores; harmless on v5e/v6e)."""
    best = 1
    for nb in range(1, n + 1):
        if n % nb:
            continue
        if nb * per_image_bytes > budget_bytes:
            break
        if n // nb < min(2, n):
            continue
        best = nb
    return best


def shortcut_connection(x_nchw, channels, stride):
    """Pallas implementation of ShortcutConnection.forward (NCHW in/out)."""
    n, c, h, w = x_nchw.shape
    pad = channels // 4
    h_s = pl.cdiv(h, stride)          # matches len(range(0, h, stride))
    w_s = pl.cdiv(w, stride)
    c_out = c + 2 * pad

    itemsize = jnp.dtype(x_nchw.dtype).itemsize
    per_image_bytes = (c * h * w + c_out * h_s * w_s) * itemsize
    n_blk = _pick_batch_block(n, per_image_bytes)

    kernel = functools.partial(
        _shortcut_kernel, stride=stride, pad=pad, h_s=h_s, w_s=w_s
    )

    out_flat = pl.pallas_call(
        kernel,
        out_shape=jax.ShapeDtypeStruct((n, c_out, h_s * w_s), x_nchw.dtype),
        grid=(n // n_blk,),
        in_specs=[pl.BlockSpec((n_blk, c, h, w), lambda i: (i, 0, 0, 0))],
        out_specs=pl.BlockSpec((n_blk, c_out, h_s * w_s), lambda i: (i, 0, 0)),
        compiler_params=pltpu.CompilerParams(dimension_semantics=("parallel",)),
    )(x_nchw)

    # Row-major split of the last dim: free (no data movement).
    return out_flat.reshape(n, c_out, h_s, w_s)


def _reference(x_nchw, channels, stride):
    pad = channels // 4
    sub = x_nchw[:, :, ::stride, ::stride]
    return jnp.pad(sub, ((0, 0), (pad, pad), (0, 0), (0, 0)))


if __name__ == "__main__":
    key = jax.random.PRNGKey(0)
    # Module-consistent small shapes: N=2, C_in=4, H=W=16; channels=8, stride=2
    # -> output (2, 4 + 2*(8//4), 8, 8) = (2, 8, 8, 8)
    x = jax.random.normal(key, (2, 4, 16, 16), dtype=jnp.float32)
    channels, stride = 8, 2

    out = shortcut_connection(x, channels, stride)
    out = jax.block_until_ready(out)

    ref = _reference(x, channels, stride)
    assert out.shape == ref.shape, (out.shape, ref.shape)
    assert out.dtype == ref.dtype, (out.dtype, ref.dtype)
    assert jnp.array_equal(out, ref), "Pallas output mismatch vs reference"

    print("KERNEL_OK")
</pallas_src>

<mosaic_0001>
module attributes {stable_mosaic.version = 11 : i64} {
  func.func @_shortcut_kernel(%arg0: i32, %arg1: memref<1x4x16x16xf32, #tpu.memory_space<vmem>>, %arg2: memref<1x8x64xf32, #tpu.memory_space<vmem>>) attributes {dimension_semantics = [#tpu.dimension_semantics<parallel>], iteration_bounds = array<i64: 2>, scalar_prefetch = 0 : i64, scratch_operands = 0 : i64, tpu.core_type = #tpu.core_type<tc>, window_params = [{transform_indices = @transform_0, window_bounds = array<i64: 1, 4, 16, 16>}, {transform_indices = @transform_1, window_bounds = array<i64: 1, 8, 64>}]} {
    %c0 = arith.constant 0 : index
    %c0_0 = arith.constant 0 : index
    %c0_1 = arith.constant 0 : index
    %c0_2 = arith.constant 0 : index
    %0 = vector.load %arg1[%c0, %c0_0, %c0_1, %c0_2] : memref<1x4x16x16xf32, #tpu.memory_space<vmem>>, vector<1x4x16x16xf32>
    %1 = vector.shape_cast %0 : vector<1x4x16x16xf32> to vector<1x4x16x8x2xf32>
    %2 = vector.extract_strided_slice %1 {offsets = [0, 0, 0, 0, 0], sizes = [1, 4, 16, 8, 1], strides = [1, 1, 1, 1, 1]} : vector<1x4x16x8x2xf32> to vector<1x4x16x8x1xf32>
    %3 = vector.shape_cast %2 : vector<1x4x16x8x1xf32> to vector<1x4x16x8xf32>
    %4 = vector.shape_cast %3 : vector<1x4x16x8xf32> to vector<1x4x8x2x8xf32>
    %5 = vector.extract_strided_slice %4 {offsets = [0, 0, 0, 0, 0], sizes = [1, 4, 8, 1, 8], strides = [1, 1, 1, 1, 1]} : vector<1x4x8x2x8xf32> to vector<1x4x8x1x8xf32>
    %6 = vector.shape_cast %5 : vector<1x4x8x1x8xf32> to vector<1x4x8x8xf32>
    %7 = vector.shape_cast %6 : vector<1x4x8x8xf32> to vector<1x4x64xf32>
    %c0_i32 = arith.constant 0 : i32
    %8 = arith.sitofp %c0_i32 : i32 to f32
    %9 = vector.broadcast %8 : f32 to vector<1x2x64xf32>
    %10 = tpu.concatenate %9, %7 in 1 : vector<1x2x64xf32>, vector<1x4x64xf32> -> vector<1x6x64xf32>
    %11 = vector.broadcast %8 : f32 to vector<1x2x64xf32>
    %12 = tpu.concatenate %10, %11 in 1 : vector<1x6x64xf32>, vector<1x2x64xf32> -> vector<1x8x64xf32>
    %c0_3 = arith.constant 0 : index
    %c0_4 = arith.constant 0 : index
    %c0_5 = arith.constant 0 : index
    %13 = vector.load %arg2[%c0_3, %c0_4, %c0_5] : memref<1x8x64xf32, #tpu.memory_space<vmem>>, vector<1x8x64xf32>
    tpu.vector_store %arg2[%c0_3, %c0_4, %c0_5], %12 {strides = array<i32>} : memref<1x8x64xf32, #tpu.memory_space<vmem>>, vector<1x8x64xf32>,
    return
  }
  func.func @transform_0(%arg0: i32) -> (i32, i32, i32, i32) {
    %c0_i32 = arith.constant 0 : i32
    %c0_i32_0 = arith.constant 0 : i32
    %c0_i32_1 = arith.constant 0 : i32
    %c0_i32_2 = arith.constant 0 : i32
    return %arg0, %c0_i32, %c0_i32_0, %c0_i32_1 : i32, i32, i32, i32
  }
  func.func @transform_1(%arg0: i32) -> (i32, i32, i32) {
    %c0_i32 = arith.constant 0 : i32
    %c0_i32_0 = arith.constant 0 : i32
    %c0_i32_1 = arith.constant 0 : i32
    return %arg0, %c0_i32, %c0_i32_0 : i32, i32, i32
  }
}

</mosaic_0001>

<bundles_post_ra>
// kernel: tpu_custom_call.1
= control target key start
LH: loop header
LB: loop body
LE: loop exit
PB: predicated region body
PF: predicated region fallthrough
CT: control target
= control target key end

     0   :  { %6 = vsyncpa [#allocation3], 0  ;;  %s2944_s0 = inlined_call_operand.hbm [shape: f32[2,4,16,16], index: 0, kind: input, shape index: {}]   ;;  %s2945_s1 = inlined_call_operand.hbm [shape: f32[2,8,64], index: 1, kind: output, shape index: {}]  }
   0x1   :  { %8 = vsyncpa [#allocation3 + $0x1], 0 }
   0x2   :  { %9 = vsyncpa [#allocation4], 0 }
   0x3   :  { %11 = vsyncpa [#allocation4 + $0x1], 0  ;;  %s1968_s6 = smov 0   ;;  %s1970_s7 = smov 0  }
   0x4   :  { %s1972_s8 = smov 0   ;;  %s1974_s9 = smov 0  }
   0x5 LB: > { %s1989_s10 = sadd.s32 4294967295, %s1942_s9   ;;  %s1772_s11 = sadd.s32 4294967294, %s1942_s9   ;;  %s1942_s9 = sphi %s1974_s9, %s3014_s9   ;;  %s1938_s8 = sphi %s1972_s8, %s3013_s8   ;;  %s1934_s7 = sphi %s1970_s7, %s3012_s7   ;;  %s1930_s6 = sphi %s1968_s6, %s3011_s6  }
   0x6   : > { %s1993_s12 = sadd.s32 1, %s1942_s9   ;;  %s24_s13 = sadd.s32 1, %s1938_s8 }
   0x7   : > { %s21_s14 = ssub.s32 %s1942_s9, %s1993_s12  ;;  %p31_p0 = scmp.ne.s32.totalorder %s1938_s8, %s1934_s7 }
   0x8   : > { %p22_p1 = scmp.eq.s32.totalorder %s21_s14, 0  ;;  %p32_p2 = scmp.eq.s32.totalorder %s1942_s9, 0 }
   0x9   : > { %p37_p3 = scmp.ne.s32.totalorder %s1934_s7, %s1930_s6  ;;  %p38_p4 = scmp.eq.s32.totalorder %s1989_s10, 0 }
   0xa   : > { %s2005_s15 = scalar_select %p22_p1, %s1938_s8, %s24_s13  }
   0xb   : > { %p2007_p5 = por %p32_p2, %p31_p0  ;;  %p2011_p6 = por %p38_p4, %p37_p3 }
   0xc   : > { %p61_p7 = scmp.eq.s32.totalorder %s1989_s10, 1  ;;  %p67_p8 = scmp.eq.s32.totalorder %s1772_s11, 1 }
   0xd   : > { %p1798_p10 = scmp.lt.s32.totalorder %s1942_s9, 2  ;;  %s87_s20 = sand.u32 1, %s1938_s8  }
   0xe   : > { %p2018_p11 = por %p61_p7, %p31_p0  ;;  %p2022_p12 = por %p67_p8, %p37_p3 }
   0xf   : > { %s1785_s21 = sshll.u32 %s1942_s9, 10  ;;  %s1775_s22 = sshll.u32 %s87_s20, 6 }
  0x10   : > { %s2960_s18 = scalar_select %p2018_p11, 1, 0 }
  0x11   : > { %s2961_s19 = scalar_select %p2022_p12, 1, 0 }
  0x12   : > { %s2031_s25 = scalar_lea.hbm %s2944_s0, %s1785_s21  ;;  %s91_s26 = scalar_lea.vmem [#allocation2], %s1775_s22 }
  0x13   : > { %s98_s27 = sshll.u32 %s91_s26, 4  ;;  %p2035_p13 = pnand %p1798_p10, %p2007_p5  ;;  %s2039_s27 = int_to_ptr.vmem [resolvable:$true] %s98_s27 }
  0x14   : > { %s2041_s29 = scalar_lea.sflag [#allocation3], %s87_s20  ;;  %s1846_s30 = scalar_lea.hbm %s2031_s25, 1024 }
  0x15   : > { %p1847_p0 = scmp.ne.s32.totalorder %s2031_s25, %s1846_s30  ;;  %p1848_p1 = pneg %p2035_p13 }
  0x16   : > { %s1851_s4 = scalar_lea.hbm %s2944_s0, 2048  ;;  %p1852_p4 = scmp.lt.u32.totalorder %s2031_s25, %s2944_s0 }
  0x17   : > { %p1849_p2 = pnand %p1848_p1, %p1847_p0  ;;  %p1853_p5 = scmp.lt.u32.totalorder %s1851_s4, %s1846_s30 }
  0x18   : > { %p1855_p8 = scmp.lt.u32.totalorder %s1846_s30, %s2031_s25 }
  0x19   : > { %p1850_p3 = pneg %p1849_p2  ;;  %p1854_p7 = por %p1853_p5, %p1852_p4 }
  0x1b   : > { %p1856_p10 = por %p1855_p8, %p1854_p7 }
  0x1d   : > { %p1857_p9 = pnand %p1856_p10, %p1850_p3 }
  0x1f   : > { %1860 = shalt.err (!%p1857_p9)
}
  0x20   : > { %s1861_s13 = scalar_lea.vmem %s2039_s27, 1024  ;;  %s1944_s14 = smov [#allocation2]  }
  0x21   : > { %p1862_p0 = scmp.ne.s32.totalorder %s2039_s27, %s1861_s13  ;;  %s1866_s16 = sshll.u32 %s1944_s14, 4  ;;  %s1867_s16 = int_to_ptr.vmem [resolvable:$false] %s1866_s16 }
  0x22   : > { %s1868_s20 = scalar_lea.vmem %s1867_s16, 2048  ;;  %p1869_p11 = scmp.lt.s32.totalorder %s2039_s27, %s1867_s16 }
  0x23   : > { %p1864_p2 = pnand %p1862_p0, %p1848_p1  ;;  %p1870_p4 = scmp.lt.s32.totalorder %s1868_s20, %s1861_s13 }
  0x25   : > { %p1865_p12 = pneg %p1864_p2  ;;  %p1871_p5 = por %p1870_p4, %p1869_p11 }
  0x27   : > { %p1872_p7 = pnand %p1871_p5, %p1865_p12 }
  0x29   : > { %1875 = shalt.err (!%p1872_p7)
}
  0x2a   : > { %s1945_s21 = smov 128   ;;  %s1946_s22 = smov 8  }
  0x2b   : > { %1793 = dma.hbm_to_vmem [thread:$0]  (!%p2035_p13), %s2031_s25, 1024, %s2039_s27, %s2041_s29, %s1945_s21, %s1945_s21, %s1946_s22  }
  0x2c   : > { %p1778_p9 = scmp.ge.s32.totalorder %s1942_s9, 1  ;;  %p106_p1 = scmp.lt.s32.totalorder %s1942_s9, 3 }
  0x2e   : > { %p107_p3 = pnand %p1778_p9, %p106_p1 }
  0x30   : > { %110 = sbr.rel (%p107_p3) target bundleno = 492 (0x1ec), region = 24 }
  0x37   : > { %s2072_s23 = sand.u32 1, %s1934_s7  }
  0x38   : > { %s1779_s24 = sshll.u32 %s2072_s23, 6  ;;  %s113_s26 = scalar_lea.sflag [#allocation3], %s2072_s23 }
  0x39   : > { %s116_s30 = scalar_lea.vmem [#allocation2], %s1779_s24 }
  0x3a   : > { %1921 = dma.done.wait (%p2011_p6), %s113_s26, 1024  }
  0x3b   : > { %1923 = vsyncadd (%p2011_p6), %s113_s26, 4294966272  ;;  %v2080_v0 = vld [vmem:[%s116_s30 + $0x10] sm:$0xff]  ;;  %v2082_v1 = vld [vmem:[%s116_s30] sm:$0xff]  ;;  %s1947_s25 = smov 126   ;;  %s1948_s17 = smov 124   ;;  %v1953_v8 = vmov 0   ;;  %v2947_v21 = vlaneseq }
  0x3c   : > { %155 = vrot.lane.b32.xlu1 %v2080_v0, %s1947_s25  ;;  %151 = vrot.lane.b32.xlu0 %v2082_v1, %s1947_s25  ;;  %v2086_v2 = vld [vmem:[%s116_s30 + $0x18] sm:$0xff]  ;;  %v2088_v3 = vld [vmem:[%s116_s30 + $0x8] sm:$0xff]  ;;  %s1949_s27 = smov 122   ;;  %s1950_s28 = smov 120   ;;  %v1955_v19 = vmov 1983009808  }
  0x3d   : > { %v2092_v4 = vld [vmem:[%s116_s30 + $0x28] sm:$0xff]  ;;  %v2094_v5 = vld [vmem:[%s116_s30 + $0x20] sm:$0xff]  ;;  %v2098_v6 = vld [vmem:[%s116_s30 + $0x38] sm:$0xff]  ;;  %s1951_s29 = smov 118   ;;  %s1952_s2 = smov 116   ;;  %1845 = vset.pattern.permute.xlu1 %v1953_v8  ;;  %1844 = vset.pattern.permute.xlu0 %v1953_v8  ;;  %v322_v20 = vunpack.c.l.s4 %v1955_v19  ;;  %v2165_v25 = vshrl.u32 %v2947_v21, 7 }
  0x3e   : > { %v2100_v7 = vld [vmem:[%s116_s30 + $0x30] sm:$0xff]  ;;  %s1954_s3 = smov 114   ;;  %vm1514_vm0 = vcmask 130112   ;;  %vm1521_vm1 = vcmask 195712   ;;  %vm1528_vm2 = vcmask 261312   ;;  %vm1535_vm3 = vcmask 326912  }
  0x3f   : > { %v323_v24 = vunpack.c.0.s8 %v322_v20  ;;  %2963 = vst [vmem:[#allocation8_spill] sm:$0xff] %v2165_v25  ;;  %vm1542_vm4 = vcmask 392512   ;;  %vm1549_vm5 = vcmask 458112   ;;  %vm1556_vm6 = vcmask 523712   ;;  %s1780_s4 = sshll.u32 %s2072_s23, 3  ;;  %s1782_s5 = sshll.u32 %s1989_s10, 7 }
  0x40   : > { %157 = vrot.lane.b32.xlu1 %v2086_v2, %s1947_s25  ;;  %153 = vrot.lane.b32.xlu0 %v2088_v3, %s1947_s25  ;;  %vm1675_vm7 = vcmask 1043459   ;;  %vm1677_vm8 = vcmask 1044484   ;;  %vm1679_vm9 = vcmask 1045509   ;;  %vm1682_vm10 = vcmask 1041408   ;;  %s134_s11 = scalar_lea.vmem [#allocation5], %s1780_s4  ;;  %s2900_s20 = scalar_lea.hbm %s2945_s1, %s1782_s5 }
  0x41   : > { %v2168_v28 = vsub.s32 %v323_v24, %v2165_v25  ;;  %s1702_s13 = sshll.u32 %s134_s11, 4  ;;  %vm1684_vm11 = vcmask 1045504   ;;  %vm1686_vm12 = vcmask 523264   ;;  %s1689_s10 = scalar_lea.sflag [#allocation4], %s2072_s23  ;;  %s2902_s13 = int_to_ptr.vmem [resolvable:$true] %s1702_s13 }
  0x42   : > { %s1876_s21 = scalar_lea.vmem %s2902_s13, 128  ;;  %p3008_p11 = scmp.ne.s32.totalorder %s2960_s18, 0 }
  0x43   : > { %p1877_p6 = scmp.ne.s32.totalorder %s2902_s13, %s1876_s21  ;;  %s1957_s22 = smov [#allocation5]  }
  0x44   : > { %161 = vrot.lane.b32.xlu1 %v2092_v4, %s1947_s25  ;;  %159 = vrot.lane.b32.xlu0 %v2094_v5, %s1947_s25  ;;  %s1880_s24 = sshll.u32 %s1957_s22, 4  ;;  %s1881_s24 = int_to_ptr.vmem [resolvable:$false] %s1880_s24 }
  0x45   : > { %p1878_p12 = pnand %p1877_p6, %p3008_p11  ;;  %s1882_s26 = scalar_lea.vmem %s1881_s24, 256 }
  0x46   : > { %p1883_p8 = scmp.lt.s32.totalorder %s2902_s13, %s1881_s24  ;;  %p1884_p10 = scmp.lt.s32.totalorder %s1882_s26, %s1876_s21 }
  0x47   : > { %p1879_p13 = pneg %p1878_p12 }
  0x48   : > { %165 = vrot.lane.b32.xlu1 %v2098_v6, %s1947_s25  ;;  %163 = vrot.lane.b32.xlu0 %v2100_v7, %s1947_s25  ;;  %p1885_p0 = por %p1884_p10, %p1883_p8 }
  0x4a   : > { %p1886_p2 = pnand %p1885_p0, %p1879_p13 }
  0x4c   : > { %177 = vrot.lane.b32.xlu1 %v2088_v3, %s1948_s17  ;;  %175 = vrot.lane.b32.xlu0 %v2082_v1, %s1948_s17 }
  0x50   : > { %181 = vrot.lane.b32.xlu1 %v2086_v2, %s1948_s17  ;;  %179 = vrot.lane.b32.xlu0 %v2080_v0, %s1948_s17 }
  0x54   : > { %185 = vrot.lane.b32.xlu1 %v2092_v4, %s1948_s17  ;;  %183 = vrot.lane.b32.xlu0 %v2094_v5, %s1948_s17 }
  0x58   : > { %189 = vrot.lane.b32.xlu1 %v2098_v6, %s1948_s17  ;;  %187 = vrot.lane.b32.xlu0 %v2100_v7, %s1948_s17 }
  0x5c   : > { %201 = vrot.lane.b32.xlu1 %v2088_v3, %s1949_s27  ;;  %199 = vrot.lane.b32.xlu0 %v2082_v1, %s1949_s27 }
  0x60   : > { %205 = vrot.lane.b32.xlu1 %v2086_v2, %s1949_s27  ;;  %203 = vrot.lane.b32.xlu0 %v2080_v0, %s1949_s27 }
  0x64   : > { %209 = vrot.lane.b32.xlu1 %v2092_v4, %s1949_s27  ;;  %207 = vrot.lane.b32.xlu0 %v2094_v5, %s1949_s27 }
  0x68   : > { %213 = vrot.lane.b32.xlu1 %v2098_v6, %s1949_s27  ;;  %211 = vrot.lane.b32.xlu0 %v2100_v7, %s1949_s27 }
  0x6c   : > { %225 = vrot.lane.b32.xlu1 %v2088_v3, %s1950_s28  ;;  %223 = vrot.lane.b32.xlu0 %v2082_v1, %s1950_s28 }
  0x70   : > { %229 = vrot.lane.b32.xlu1 %v2086_v2, %s1950_s28  ;;  %227 = vrot.lane.b32.xlu0 %v2080_v0, %s1950_s28 }
  0x74   : > { %233 = vrot.lane.b32.xlu1 %v2092_v4, %s1950_s28  ;;  %231 = vrot.lane.b32.xlu0 %v2094_v5, %s1950_s28 }
  0x78   : > { %237 = vrot.lane.b32.xlu1 %v2098_v6, %s1950_s28  ;;  %235 = vrot.lane.b32.xlu0 %v2100_v7, %s1950_s28 }
  0x7c   : > { %249 = vrot.lane.b32.xlu1 %v2088_v3, %s1951_s29  ;;  %247 = vrot.lane.b32.xlu0 %v2082_v1, %s1951_s29 }
  0x80   : > { %253 = vrot.lane.b32.xlu1 %v2086_v2, %s1951_s29  ;;  %251 = vrot.lane.b32.xlu0 %v2080_v0, %s1951_s29 }
  0x84   : > { %257 = vrot.lane.b32.xlu1 %v2092_v4, %s1951_s29  ;;  %255 = vrot.lane.b32.xlu0 %v2094_v5, %s1951_s29 }
  0x88   : > { %261 = vrot.lane.b32.xlu1 %v2098_v6, %s1951_s29  ;;  %259 = vrot.lane.b32.xlu0 %v2100_v7, %s1951_s29 }
  0x8c   : > { %273 = vrot.lane.b32.xlu1 %v2088_v3, %s1952_s2  ;;  %271 = vrot.lane.b32.xlu0 %v2082_v1, %s1952_s2 }
  0x90   : > { %277 = vrot.lane.b32.xlu1 %v2086_v2, %s1952_s2  ;;  %275 = vrot.lane.b32.xlu0 %v2080_v0, %s1952_s2 }
  0x94   : > { %281 = vrot.lane.b32.xlu1 %v2092_v4, %s1952_s2  ;;  %279 = vrot.lane.b32.xlu0 %v2094_v5, %s1952_s2 }
  0x98   : > { %299 = vrot.lane.b32.xlu1 %v2080_v0, %s1954_s3  ;;  %295 = vrot.lane.b32.xlu0 %v2082_v1, %s1954_s3 }
  0x9c   : > { %283 = vrot.lane.b32.xlu1 %v2100_v7, %s1952_s2  ;;  %303 = vrot.lane.b32.xlu0 %v2094_v5, %s1954_s3 }
  0xa0   : > { %297 = vrot.lane.b32.xlu1 %v2088_v3, %s1954_s3  ;;  %307 = vrot.lane.b32.xlu0 %v2100_v7, %s1954_s3 }
  0xa4   : > { %305 = vrot.lane.b32.xlu1 %v2092_v4, %s1954_s3  ;;  %301 = vrot.lane.b32.xlu0 %v2086_v2, %s1954_s3 }
  0xa8   : > { %309 = vrot.lane.b32.xlu1 %v2098_v6, %s1954_s3  ;;  %285 = vrot.lane.b32.xlu0 %v2098_v6, %s1952_s2 }
  0xae   : > { %v2152_v9 = vpop.permute.xlu1 %155  ;;  %v152_v10 = vpop.permute.xlu0 %151 }
  0xb2   : > { %v2154_v11 = vpop.permute.xlu1 %157  ;;  %v154_v12 = vpop.permute.xlu0 %153 }
  0xb6   : > { %v2156_v13 = vpop.permute.xlu1 %161  ;;  %v2158_v14 = vpop.permute.xlu0 %159 }
  0xba   : > { %v2160_v15 = vpop.permute.xlu1 %165  ;;  %v2162_v16 = vpop.permute.xlu0 %163 }
  0xbe   : > { %v178_v17 = vpop.permute.xlu1 %177  ;;  %v176_v18 = vpop.permute.xlu0 %175 }
  0xbf   : > { %v451_v29 = vcombine.low %v2088_v3, %v178_v17  ;;  %v452_v30 = vcombine.high %v2088_v3, %v178_v17  ;;  %v319_v31 = vcombine.low %v2082_v1, %v176_v18  ;;  %v320_v32 = vcombine.high %v2082_v1, %v176_v18 }
  0xc1   : > { %v2183_v41 = vrot.slane %v451_v29, %v2168_v28  ;;  %v2186_v42 = vrot.slane %v452_v30, %v2168_v28  ;;  %v2189_v43 = vrot.slane %v319_v31, %v2168_v28  ;;  %v2192_v44 = vrot.slane %v320_v32, %v2168_v28 }
  0xc2   : > { %v182_v22 = vpop.permute.xlu1 %181  ;;  %v180_v23 = vpop.permute.xlu0 %179 }
  0xc3   : > { %v715_v33 = vcombine.low %v2086_v2, %v182_v22  ;;  %v716_v34 = vcombine.high %v2086_v2, %v182_v22  ;;  %v583_v37 = vcombine.low %v2080_v0, %v180_v23  ;;  %v584_v38 = vcombine.high %v2080_v0, %v180_v23 }
  0xc5   : > { %v2195_v45 = vrot.slane %v715_v33, %v2168_v28  ;;  %v2198_v46 = vrot.slane %v716_v34, %v2168_v28  ;;  %v2203_v55 = vrot.slane %v583_v37, %v2168_v28  ;;  %v2206_v56 = vrot.slane %v584_v38, %v2168_v28 }
  0xc6   : > { %v186_v26 = vpop.permute.xlu1 %185  ;;  %v184_v27 = vpop.permute.xlu0 %183 }
  0xc7   : > { %v979_v39 = vcombine.low %v2092_v4, %v186_v26  ;;  %v980_v40 = vcombine.high %v2092_v4, %v186_v26  ;;  %v847_v47 = vcombine.low %v2094_v5, %v184_v27  ;;  %v848_v48 = vcombine.high %v2094_v5, %v184_v27 }
  0xc9   : > { %v2209_v57 = vrot.slane %v979_v39, %v2168_v28  ;;  %v2212_v58 = vrot.slane %v980_v40, %v2168_v28  ;;  %v2227_v63 = vrot.slane %v847_v47, %v2168_v28  ;;  %v2230_v0 = vrot.slane %v848_v48, %v2168_v28 }
  0xca   : > { %v190_v35 = vpop.permute.xlu1 %189  ;;  %v2176_v36 = vpop.permute.xlu0 %187 }
  0xcb   : > { %2964 = vst [vmem:[#allocation9_spill] sm:$0xff] %v2227_v63  ;;  %v1243_v1 = vcombine.low %v2098_v6, %v190_v35  ;;  %v1244_v2 = vcombine.high %v2098_v6, %v190_v35  ;;  %v1111_v29 = vcombine.low %v2100_v7, %v2176_v36  ;;  %v1112_v30 = vcombine.high %v2100_v7, %v2176_v36 }
  0xcd   : > { %v2255_v26 = vrot.slane %v1243_v1, %v2168_v28  ;;  %v2258_v27 = vrot.slane %v1244_v2, %v2168_v28 }
  0xce   : > { %v202_v49 = vpop.permute.xlu1 %201  ;;  %v200_v50 = vpop.permute.xlu0 %199 }
  0xcf   : > { %v467_v51 = vcombine.low %v154_v12, %v202_v49  ;;  %v468_v52 = vcombine.high %v154_v12, %v202_v49  ;;  %v335_v53 = vcombine.low %v152_v10, %v200_v50  ;;  %v336_v54 = vcombine.high %v152_v10, %v200_v50 }
  0xd1   : > { %v2215_v59 = vrot.slane %v467_v51, %v2168_v28  ;;  %v2218_v60 = vrot.slane %v468_v52, %v2168_v28  ;;  %v2221_v61 = vrot.slane %v335_v53, %v2168_v28  ;;  %v2224_v62 = vrot.slane %v336_v54, %v2168_v28 }
  0xd2   : > { %v206_v3 = vpop.permute.xlu1 %205  ;;  %v204_v4 = vpop.permute.xlu0 %203 }
  0xd3   : > { %v515_v5 = vcombine.low %v2183_v41, %v2215_v59  ;;  %v516_v8 = vcombine.high %v2183_v41, %v2215_v59  ;;  %v531_v10 = vcombine.low %v2186_v42, %v2218_v60  ;;  %v383_v17 = vcombine.low %v2189_v43, %v2221_v61 }
  0xd4   : > { %v384_v6 = vcombine.high %v2189_v43, %v2221_v61  ;;  %v399_v18 = vcombine.low %v2192_v44, %v2224_v62  ;;  %v400_v19 = vcombine.high %v2192_v44, %v2224_v62  ;;  %v731_v20 = vcombine.low %v2154_v11, %v206_v3 }
  0xd5   : > { %v732_v22 = vcombine.high %v2154_v11, %v206_v3  ;;  %v599_v23 = vcombine.low %v2152_v9, %v204_v4  ;;  %v600_v24 = vcombine.high %v2152_v9, %v204_v4  ;;  %v2966_v62 = vcombine.high %v2186_v42, %v2218_v60 }
  0xd6   : > { %v210_v31 = vpop.permute.xlu1 %209  ;;  %v208_v32 = vpop.permute.xlu0 %207  ;;  %v2265_v11 = vrot.slane %v731_v20, %v2168_v28 }
  0xd7   : > { %v2268_v33 = vrot.slane %v732_v22, %v2168_v28  ;;  %v2271_v9 = vrot.slane %v599_v23, %v2168_v28  ;;  %v2274_v34 = vrot.slane %v600_v24, %v2168_v28  ;;  %v995_v35 = vcombine.low %v2156_v13, %v210_v31 }
  0xd8   : > { %v996_v37 = vcombine.high %v2156_v13, %v210_v31  ;;  %v863_v7 = vcombine.low %v2158_v14, %v208_v32  ;;  %v864_v36 = vcombine.high %v2158_v14, %v208_v32  ;;  %v1126_v32 = vrot.slane %v1112_v30, %v2168_v28 }
  0xd9   : > { %v2297_v52 = vrot.slane %v995_v35, %v2168_v28  ;;  %v2968_v41 = vcombine.high %v2203_v55, %v2271_v9  ;;  %v2970_v42 = vcombine.high %v2206_v56, %v2274_v34 }
  0xda   : > { %v214_v50 = vpop.permute.xlu1 %213  ;;  %v212_v51 = vpop.permute.xlu0 %211  ;;  %v2300_v53 = vrot.slane %v996_v37, %v2168_v28  ;;  %v2303_v54 = vrot.slane %v863_v7, %v2168_v28  ;;  %v2306_v1 = vrot.slane %v864_v36, %v2168_v28 }
  0xdb   : > { %v1259_v2 = vcombine.low %v2160_v15, %v214_v50  ;;  %v1260_v3 = vcombine.high %v2160_v15, %v214_v50  ;;  %v1127_v4 = vcombine.low %v2162_v16, %v212_v51  ;;  %v1128_v20 = vcombine.high %v2162_v16, %v212_v51 }
  0xdc   : > { %2965 = vst [vmem:[#allocation10_spill] sm:$0xff] %v2303_v54  ;;  %v927_v16 = vcombine.low %v2230_v0, %v2306_v1  ;;  %v928_v35 = vcombine.high %v2230_v0, %v2306_v1  ;;  %v1119_v15 = vrot.slane %v1111_v29, %v2168_v28 }
  0xdd   : > { %v2333_v36 = vrot.slane %v1259_v2, %v2168_v28  ;;  %v2336_v50 = vrot.slane %v1260_v3, %v2168_v28  ;;  %v1135_v51 = vrot.slane %v1127_v4, %v2168_v28  ;;  %v1142_v21 = vrot.slane %v1128_v20, %v2168_v28 }
  0xde   : > { %v2328_v37 = vpop.permute.xlu1 %225  ;;  %v2330_v7 = vpop.permute.xlu0 %223 }
  0xdf   : > { %v1307_v0 = vcombine.low %v2255_v26, %v2333_v36  ;;  %v1308_v1 = vcombine.high %v2255_v26, %v2333_v36  ;;  %v1323_v2 = vcombine.low %v2258_v27, %v2336_v50  ;;  %v1324_v3 = vcombine.high %v2258_v27, %v2336_v50 }
  0xe0   : > { %v1175_v31 = vcombine.low %v1119_v15, %v1135_v51  ;;  %v1176_v4 = vcombine.high %v1119_v15, %v1135_v51  ;;  %v1191_v24 = vcombine.low %v1126_v32, %v1142_v21  ;;  %v1192_v20 = vcombine.high %v1126_v32, %v1142_v21 }
  0xe1   : > { %v1956_v21 = vmov 1934713408  }
  0xe2   : > { %v2350_v47 = vpop.permute.xlu1 %229  ;;  %v2352_v29 = vpop.permute.xlu0 %227  ;;  %v386_v32 = vunpack.c.l.s4 %v1956_v21 }
  0xe4   : > { %v387_v22 = vunpack.c.0.s8 %v386_v32 }
  0xe6   : > { %v2354_v30 = vpop.permute.xlu1 %233  ;;  %v2356_v23 = vpop.permute.xlu0 %231  ;;  %v2379_v14 = vsub.s32 %v387_v22, %v2165_v25 }
  0xe8   : > { %v2385_v12 = vrot.slane %v384_v6, %v2379_v14  ;;  %v2391_v21 = vrot.slane %v383_v17, %v2379_v14  ;;  %v2397_v22 = vrot.slane %v399_v18, %v2379_v14  ;;  %v2403_v32 = vrot.slane %v400_v19, %v2379_v14 }
  0xe9   : > { %v2409_v6 = vrot.slane %v515_v5, %v2379_v14  ;;  %v2415_v17 = vrot.slane %v516_v8, %v2379_v14  ;;  %v2421_v44 = vrot.slane %v531_v10, %v2379_v14  ;;  %v2427_v5 = vrot.slane %v2966_v62, %v2379_v14 }
  0xea   : > { %v2358_v40 = vpop.permute.xlu1 %237  ;;  %v2360_v26 = vpop.permute.xlu0 %235  ;;  %v2967_v18 = vcombine.low %v2203_v55, %v2271_v9  ;;  %v2439_v59 = vrot.slane %v2968_v41, %v2379_v14  ;;  %v2969_v8 = vcombine.low %v2206_v56, %v2274_v34  ;;  %v2451_v60 = vrot.slane %v2970_v42, %v2379_v14 }
  0xeb   : > { %v2971_v62 = vcombine.low %v2195_v45, %v2265_v11  ;;  %v2460_v55 = vrot.slane %v927_v16, %v2379_v14  ;;  %v2463_v9 = vrot.slane %v1176_v4, %v2379_v14  ;;  %v2466_v41 = vrot.slane %v1175_v31, %v2379_v14 }
  0xec   : > { %v2433_v19 = vrot.slane %v2967_v18, %v2379_v14  ;;  %v2445_v10 = vrot.slane %v2969_v8, %v2379_v14  ;;  %v2469_v8 = vrot.slane %v1191_v24, %v2379_v14  ;;  %v2472_v56 = vrot.slane %v928_v35, %v2379_v14 }
  0xed   : > { %v2457_v18 = vrot.slane %v2971_v62, %v2379_v14  ;;  %v2972_v34 = vcombine.low %v2209_v57, %v2297_v52  ;;  %v2973_v16 = vcombine.high %v2195_v45, %v2265_v11  ;;  %v2974_v24 = vcombine.low %v2198_v46, %v2268_v33 }
  0xee   : > { %v2362_v36 = vpop.permute.xlu1 %249  ;;  %v2364_v39 = vpop.permute.xlu0 %247  ;;  %v2493_v25 = vrot.slane %v1192_v20, %v2379_v14  ;;  %v2502_v45 = vrot.slane %v1307_v0, %v2379_v14  ;;  %v2976_v11 = vcombine.high %v2198_v46, %v2268_v33  ;;  %v2978_v20 = vcombine.low %v2212_v58, %v2300_v53 }
  0xef   : > { %v2478_v42 = vrot.slane %v2972_v34, %v2379_v14  ;;  %v2484_v4 = vrot.slane %v2973_v16, %v2379_v14  ;;  %v2490_v31 = vrot.slane %v2974_v24, %v2379_v14  ;;  %v2975_v34 = vcombine.high %v2209_v57, %v2297_v52 }
  0xf0   : > { %v2508_v16 = vrot.slane %v2976_v11, %v2379_v14  ;;  %v2514_v24 = vrot.slane %v2978_v20, %v2379_v14  ;;  %v2517_v63 = vrot.slane %v1308_v1, %v2379_v14  ;;  %v2981_v57 = vcombine.high %v2212_v58, %v2300_v53 }
  0xf1   : > { %v2499_v54 = vrot.slane %v2975_v34, %v2379_v14  ;;  %v2526_v0 = vrot.slane %v1323_v2, %v2379_v14  ;;  %v2532_v11 = vrot.slane %v1324_v3, %v2379_v14 }
  0xf2   : > { %v2366_v27 = vpop.permute.xlu1 %253  ;;  %v2368_v15 = vpop.permute.xlu0 %251  ;;  %2977 = vst [vmem:[#allocation11_spill] sm:$0xff] %v2508_v16  ;;  %2979 = vst [vmem:[#allocation12_spill] sm:$0xff] %v2514_v24  ;;  %v2523_v52 = vrot.slane %v2981_v57, %v2379_v14 }
  0xf3   : > { %2980 = vst [vmem:[#allocation13_spill] sm:$0xff] %v2517_v63  ;;  %2983 = vst [vmem:[#allocation15_spill] sm:$0xff] %v2526_v0 }
  0xf4   : > { %2982 = vst [vmem:[#allocation14_spill] sm:$0xff] %v2523_v52  ;;  %2984 = vst [vmem:[#allocation16_spill] sm:$0xff] %v2532_v11 }
  0xf6   : > { %v2370_v50 = vpop.permute.xlu1 %257  ;;  %v2372_v51 = vpop.permute.xlu0 %255 }
  0xfa   : > { %v2374_v38 = vpop.permute.xlu1 %261  ;;  %v2376_v49 = vpop.permute.xlu0 %259 }
  0xfe   : > { %v274_v13 = vpop.permute.xlu1 %273  ;;  %v272_v48 = vpop.permute.xlu0 %271 }
  0xff   : > { %v483_v46 = vcombine.low %v2328_v37, %v274_v13  ;;  %v484_v33 = vcombine.high %v2328_v37, %v274_v13  ;;  %v351_v34 = vcombine.low %v2330_v7, %v272_v48  ;;  %v352_v1 = vcombine.high %v2330_v7, %v272_v48 }
 0x102   : > { %v278_v43 = vpop.permute.xlu1 %277  ;;  %v276_v61 = vpop.permute.xlu0 %275 }
 0x103   : > { %v747_v20 = vcombine.low %v2350_v47, %v278_v43  ;;  %v748_v58 = vcombine.high %v2350_v47, %v278_v43  ;;  %v615_v53 = vcombine.low %v2352_v29, %v276_v61  ;;  %v616_v2 = vcombine.high %v2352_v29, %v276_v61 }
 0x104   : > { %v2547_v43 = vrot.slane %v483_v46, %v2168_v28  ;;  %v2550_v29 = vrot.slane %v484_v33, %v2168_v28 }
 0x105   : > { %v2556_v11 = vrot.slane %v747_v20, %v2168_v28 }
 0x106   : > { %v282_v35 = vpop.permute.xlu1 %281  ;;  %v280_v62 = vpop.permute.xlu0 %279 }
 0x107   : > { %v1011_v57 = vcombine.low %v2354_v30, %v282_v35  ;;  %v1012_v0 = vcombine.high %v2354_v30, %v282_v35  ;;  %v879_v13 = vcombine.low %v2356_v23, %v280_v62  ;;  %v359_v30 = vrot.slane %v351_v34, %v2168_v28 }
 0x108   : > { %v880_v61 = vcombine.high %v2356_v23, %v280_v62  ;;  %v366_v35 = vrot.slane %v352_v1, %v2168_v28  ;;  %v2573_v34 = vrot.slane %v616_v2, %v2168_v28 }
 0x109   : > { %v2576_v1 = vrot.slane %v1011_v57, %v2168_v28  ;;  %v2579_v20 = vrot.slane %v1012_v0, %v2168_v28 }
 0x10a   : > { %v300_v37 = vpop.permute.xlu1 %299  ;;  %v296_v52 = vpop.permute.xlu0 %295 }
 0x10b   : > { %v631_v3 = vcombine.low %v2368_v15, %v300_v37  ;;  %v632_v48 = vcombine.high %v2368_v15, %v300_v37  ;;  %v367_v7 = vcombine.low %v2364_v39, %v296_v52  ;;  %v368_v47 = vcombine.high %v2364_v39, %v296_v52 }
 0x10c   : > { %v2561_v39 = vrot.slane %v748_v58, %v2168_v28  ;;  %v2564_v52 = vrot.slane %v615_v53, %v2168_v28  ;;  %v2582_v58 = vrot.slane %v879_v13, %v2168_v28  ;;  %v2585_v53 = vrot.slane %v880_v61, %v2168_v28 }
 0x10d   : > { %v375_v15 = vrot.slane %v367_v7, %v2168_v28  ;;  %v382_v37 = vrot.slane %v368_v47, %v2168_v28  ;;  %v2567_v46 = vrot.slane %v631_v3, %v2168_v28  ;;  %v2570_v23 = vrot.slane %v632_v48, %v2168_v28 }
 0x10e   : > { %v284_v62 = vpop.permute.xlu1 %283  ;;  %v304_v33 = vpop.permute.xlu0 %303  ;;  %2985 = vst [vmem:[#allocation17_spill] sm:$0xff] %v2582_v58 }
 0x10f   : > { %v415_v3 = vcombine.low %v359_v30, %v375_v15  ;;  %v416_v48 = vcombine.high %v359_v30, %v375_v15  ;;  %v431_v7 = vcombine.low %v366_v35, %v382_v37  ;;  %v432_v47 = vcombine.high %v366_v35, %v382_v37 }
 0x110   : > { %v1143_v63 = vcombine.low %v2360_v26, %v284_v62  ;;  %v895_v2 = vcombine.low %v2372_v51, %v304_v33  ;;  %v896_v57 = vcombine.high %v2372_v51, %v304_v33  ;;  %v1144_v24 = vcombine.high %v2360_v26, %v284_v62 }
 0x111   : > { %v430_v51 = vrot.slane %v416_v48, %v2379_v14  ;;  %v423_v33 = vrot.slane %v415_v3, %v2379_v14  ;;  %v446_v48 = vrot.slane %v432_v47, %v2379_v14 }
 0x112   : > { %v298_v30 = vpop.permute.xlu1 %297  ;;  %v308_v15 = vpop.permute.xlu0 %307  ;;  %v2598_v35 = vrot.slane %v895_v2, %v2168_v28  ;;  %v2601_v37 = vrot.slane %v896_v57, %v2168_v28  ;;  %v2612_v2 = vrot.slane %v1143_v63, %v2168_v28  ;;  %v439_v57 = vrot.slane %v431_v7, %v2379_v14 }
 0x113   : > { %v499_v0 = vcombine.low %v2362_v36, %v298_v30  ;;  %v500_v13 = vcombine.high %v2362_v36, %v298_v30  ;;  %v1159_v61 = vcombine.low %v2376_v49, %v308_v15  ;;  %v1160_v26 = vcombine.high %v2376_v49, %v308_v15 }
 0x114   : > { %2986 = vst [vmem:[#allocation18_spill] sm:$0xff] %v2598_v35  ;;  %v2617_v3 = vrot.slane %v1144_v24, %v2168_v28  ;;  %v448_v63 = vcombine.low %v2385_v12, %v430_v51  ;;  %v447_v7 = vcombine.low %v2391_v21, %v423_v33  ;;  %v959_v36 = vcombine.low %v2585_v53, %v2601_v37 }
 0x115   : > { %v507_v30 = vrot.slane %v499_v0, %v2168_v28  ;;  %v514_v49 = vrot.slane %v500_v13, %v2168_v28  ;;  %v2624_v62 = vrot.slane %v1159_v61, %v2168_v28  ;;  %v2636_v13 = vrot.slane %v1160_v26, %v2168_v28 }
 0x116   : > { %v306_v15 = vpop.permute.xlu1 %305  ;;  %v302_v16 = vpop.permute.xlu0 %301  ;;  %1411 = vperm.xlu1 %1845, %v448_v63   ;;  %1408 = vperm.xlu0 %1844, %v447_v7  }
 0x117   : > { %v1028_v47 = vcombine.high %v2370_v50, %v306_v15  ;;  %v547_v61 = vcombine.low %v2547_v43, %v507_v30  ;;  %v548_v12 = vcombine.high %v2547_v43, %v507_v30  ;;  %v563_v21 = vcombine.low %v2550_v29, %v514_v49 }
 0x118   : > { %v1027_v51 = vcombine.low %v2370_v50, %v306_v15  ;;  %v564_v33 = vcombine.high %v2550_v29, %v514_v49  ;;  %v763_v0 = vcombine.low %v2366_v27, %v302_v16  ;;  %v764_v26 = vcombine.high %v2366_v27, %v302_v16 }
 0x119   : > { %v2644_v24 = vrot.slane %v1028_v47, %v2168_v28  ;;  %v1207_v58 = vcombine.low %v2612_v2, %v2624_v62  ;;  %v449_v43 = vcombine.low %v2397_v22, %v439_v57  ;;  %v1208_v29 = vcombine.high %v2612_v2, %v2624_v62 }
 0x11a   : > { %v310_v35 = vpop.permute.xlu1 %309  ;;  %v286_v15 = vpop.permute.xlu0 %285  ;;  %v450_v16 = vcombine.low %v2403_v32, %v446_v48  ;;  %v771_v63 = vrot.slane %v763_v0, %v2168_v28  ;;  %v2662_v22 = vrot.slane %v764_v26, %v2168_v28  ;;  %v555_v57 = vrot.slane %v547_v61, %v2379_v14 }
 0x11b   : > { %v1291_v30 = vcombine.low %v2374_v38, %v310_v35  ;;  %v1292_v50 = vcombine.high %v2374_v38, %v310_v35  ;;  %v1091_v49 = vcombine.low %v2579_v20, %v2644_v24  ;;  %v1092_v27 = vcombine.high %v2579_v20, %v2644_v24  ;;  %1414 = vperm.xlu1 %1845, %v449_v43   ;;  %v2998_v20 = vld [vmem:[#allocation14_spill] sm:$0xff] }
 0x11c   : > { %1417 = vperm.xlu0 %1844, %v450_v16   ;;  %v1275_v62 = vcombine.low %v2358_v40, %v286_v15  ;;  %v1276_v2 = vcombine.high %v2358_v40, %v286_v15  ;;  %v562_v32 = vrot.slane %v548_v12, %v2379_v14  ;;  %v1035_v48 = vrot.slane %v1027_v51, %v2168_v28 }
 0x11d   : > { %v2665_v38 = vrot.slane %v1291_v30, %v2168_v28  ;;  %v2668_v35 = vrot.slane %v1292_v50, %v2168_v28  ;;  %v811_v7 = vcombine.low %v2556_v11, %v771_v63  ;;  %v827_v47 = vcombine.low %v2561_v39, %v2662_v22 }
 0x11e   : > { %v828_v0 = vcombine.high %v2561_v39, %v2662_v22  ;;  %v1283_v26 = vrot.slane %v1275_v62, %v2168_v28  ;;  %v1290_v43 = vrot.slane %v1276_v2, %v2168_v28  ;;  %v579_v40 = vcombine.low %v2409_v6, %v555_v57 }
 0x11f   : > { %v580_v61 = vcombine.low %v2415_v17, %v562_v32  ;;  %v571_v12 = vrot.slane %v563_v21, %v2379_v14  ;;  %v578_v51 = vrot.slane %v564_v33, %v2379_v14  ;;  %v2987_v30 = vcombine.low %v2564_v52, %v2567_v46 }
 0x120   : > { %v2988_v39 = vcombine.high %v2564_v52, %v2567_v46  ;;  %v1339_v28 = vcombine.low %v1283_v26, %v2665_v38  ;;  %v1340_v6 = vcombine.high %v1283_v26, %v2665_v38  ;;  %v1355_v17 = vcombine.low %v1290_v43, %v2668_v35  ;;  %1420 = vperm.xlu1 %1845, %v579_v40  }
 0x121   : > { %v687_v50 = vrot.slane %v2987_v30, %v2379_v14  ;;  %v1356_v21 = vcombine.high %v1290_v43, %v2668_v35  ;;  %v1223_v33 = vcombine.low %v2617_v3, %v2636_v13  ;;  %v1224_v16 = vcombine.high %v2617_v3, %v2636_v13  ;;  %1423 = vperm.xlu0 %1844, %v580_v61  }
 0x122   : > { %v694_v15 = vrot.slane %v2988_v39, %v2379_v14  ;;  %v1075_v22 = vcombine.low %v2576_v1, %v1035_v48  ;;  %v1076_v52 = vcombine.high %v2576_v1, %v1035_v48  ;;  %v812_v46 = vcombine.high %v2556_v11, %v771_v63 }
 0x123   : > { %v581_v38 = vcombine.low %v2421_v44, %v571_v12  ;;  %v2989_v35 = vcombine.low %v2573_v34, %v2570_v23  ;;  %v819_v2 = vrot.slane %v811_v7, %v2379_v14  ;;  %v582_v57 = vcombine.low %v2427_v5, %v578_v51 }
 0x124   : > { %v967_v3 = vrot.slane %v959_v36, %v2379_v14  ;;  %v1222_v13 = vrot.slane %v1208_v29, %v2379_v14  ;;  %v1215_v1 = vrot.slane %v1207_v58, %v2379_v14  ;;  %v711_v11 = vcombine.low %v2433_v19, %v687_v50  ;;  %v2996_v50 = vld [vmem:[#allocation12_spill] sm:$0xff] }
 0x125   : > { %v703_v62 = vrot.slane %v2989_v35, %v2379_v14  ;;  %1426 = vperm.xlu1 %1845, %v581_v38   ;;  %v712_v44 = vcombine.low %v2439_v59, %v694_v15  ;;  %v2990_v63 = vcombine.high %v2573_v34, %v2570_v23  ;;  %v843_v48 = vcombine.low %v2457_v18, %v819_v2  ;;  %v2997_v15 = vld [vmem:[#allocation13_spill] sm:$0xff] }
 0x126   : > { %1429 = vperm.xlu0 %1844, %v582_v57   ;;  %v977_v36 = vcombine.low %v2460_v55, %v967_v3  ;;  %v1240_v29 = vcombine.low %v2463_v9, %v1222_v13  ;;  %v1239_v58 = vcombine.low %v2466_v41, %v1215_v1  ;;  %v1231_v19 = vrot.slane %v1223_v33, %v2379_v14 }
 0x127   : > { %v710_v32 = vrot.slane %v2990_v63, %v2379_v14  ;;  %v713_v5 = vcombine.low %v2445_v10, %v703_v62  ;;  %v2991_v59 = vcombine.high %v2585_v53, %v2601_v37  ;;  %v1083_v23 = vrot.slane %v1075_v22, %v2379_v14 }
 0x128   : > { %v826_v18 = vrot.slane %v812_v46, %v2379_v14  ;;  %v835_v34 = vrot.slane %v827_v47, %v2379_v14  ;;  %v1238_v10 = vrot.slane %v1224_v16, %v2379_v14  ;;  %v1090_v55 = vrot.slane %v1076_v52, %v2379_v14  ;;  %v3002_v16 = vld [vmem:[#allocation15_spill] sm:$0xff] }
 0x129   : > { %v974_v7 = vrot.slane %v2991_v59, %v2379_v14  ;;  %v1347_v9 = vrot.slane %v1339_v28, %v2379_v14  ;;  %1432 = vperm.xlu1 %1845, %v711_v11   ;;  %v1241_v41 = vcombine.low %v2469_v8, %v1231_v19  ;;  %v1107_v53 = vcombine.low %v2478_v42, %v1083_v23 }
 0x12a   : > { %v844_v37 = vcombine.low %v2484_v4, %v826_v18  ;;  %1435 = vperm.xlu0 %1844, %v712_v44   ;;  %v845_v43 = vcombine.low %v2490_v31, %v835_v34  ;;  %v1242_v47 = vcombine.low %v2493_v25, %v1238_v10  ;;  %v1108_v40 = vcombine.low %v2499_v54, %v1090_v55  ;;  %v2992_v54 = vld [vmem:[#allocation17_spill] sm:$0xff]  ;;  %v2993_v4 = vld [vmem:[#allocation18_spill] sm:$0xff] }
 0x12b   : > { %v978_v26 = vcombine.low %v2472_v56, %v974_v7  ;;  %v1371_v61 = vcombine.low %v2502_v45, %v1347_v9  ;;  %v842_v12 = vrot.slane %v828_v0, %v2379_v14  ;;  %v1099_v8 = vrot.slane %v1091_v49, %v2379_v14  ;;  %v2995_v49 = vld [vmem:[#allocation11_spill] sm:$0xff]  ;;  %v3007_v9 = vld [vmem:[#allocation8_spill] sm:$0xff] }
 0x12c   : > { %v1354_v56 = vrot.slane %v1340_v6, %v2379_v14  ;;  %v1106_v42 = vrot.slane %v1092_v27, %v2379_v14  ;;  %v714_v25 = vcombine.low %v2451_v60, %v710_v32  ;;  %v2994_v31 = vcombine.low %v2992_v54, %v2993_v4  ;;  %v2999_v60 = vld [vmem:[#allocation9_spill] sm:$0xff]  ;;  %v3000_v27 = vld [vmem:[#allocation10_spill] sm:$0xff] }
 0x12d   : > { %v1363_v0 = vrot.slane %v1355_v17, %v2379_v14  ;;  %v1370_v51 = vrot.slane %v1356_v21, %v2379_v14  ;;  %1438 = vperm.xlu1 %1845, %v713_v5   ;;  %v846_v30 = vcombine.low %v2995_v49, %v842_v12  ;;  %v1109_v39 = vcombine.low %v2996_v50, %v1099_v8  ;;  %v3003_v17 = vld [vmem:[#allocation16_spill] sm:$0xff] }
 0x12e   : > { %v951_v45 = vrot.slane %v2994_v31, %v2379_v14  ;;  %v1372_v28 = vcombine.low %v2997_v15, %v1354_v56  ;;  %v1110_v24 = vcombine.low %v2998_v20, %v1106_v42  ;;  %1441 = vperm.xlu0 %1844, %v714_v25   ;;  %v3001_v6 = vcombine.low %v2999_v60, %v3000_v27 }
 0x12f   : > { %v1373_v22 = vcombine.low %v3002_v16, %v1363_v0  ;;  %v1374_v52 = vcombine.low %v3003_v17, %v1370_v51  ;;  %v3004_v21 = vcombine.high %v2992_v54, %v2993_v4  ;;  %v3005_v35 = vcombine.high %v2999_v60, %v3000_v27 }
 0x130   : > { %v919_v33 = vrot.slane %v3001_v6, %v2379_v14  ;;  %v3006_v19 = vlaneseq }
 0x131   : > { %v958_v46 = vrot.slane %v3004_v21, %v2379_v14  ;;  %1444 = vperm.xlu1 %1845, %v843_v48   ;;  %v926_v62 = vrot.slane %v3005_v35, %v2379_v14 }
 0x132   : > { %v975_v38 = vcombine.low %v919_v33, %v951_v45  ;;  %v1504_v59 = vand.u32 127, %v3006_v19 }
 0x133   : > { %v976_v2 = vcombine.low %v926_v62, %v958_v46 }
 0x134   : > { %1456 = vperm.xlu0 %1844, %v975_v38   ;;  %v1509_v18 = vadd.s32 4294967288, %v1504_v59  ;;  %v1516_v10 = vadd.s32 4294967280, %v1504_v59  ;;  %v1537_v56 = vadd.s32 4294967256, %v1504_v59  ;;  %v1551_v15 = vadd.s32 4294967240, %v1504_v59 }
 0x135   : > { %1459 = vperm.xlu1 %1845, %v976_v2  }
 0x136   : > { %v2824_v0 = vsub.s32 %v1537_v56, %v3007_v9 }
 0x138   : > { %1462 = vperm.xlu0 %1844, %v977_v36  }
 0x139   : > { %1480 = vperm.xlu1 %1845, %v1239_v58  }
 0x13c   : > { %1483 = vperm.xlu0 %1844, %v1240_v29  }
 0x13d   : > { %1465 = vperm.xlu1 %1845, %v978_v26   ;;  %v2801_v26 = vsub.s32 %v1504_v59, %v3007_v9 }
 0x140   : > { %1486 = vperm.xlu0 %1844, %v1241_v41   ;;  %v2798_v41 = vsub.s32 %v1509_v18, %v3007_v9 }
 0x141   : > { %1447 = vperm.xlu1 %1845, %v844_v37  }
 0x144   : > { %1468 = vperm.xlu0 %1844, %v1107_v53   ;;  %v1523_v53 = vadd.s32 4294967272, %v1504_v59 }
 0x145   : > { %1489 = vperm.xlu1 %1845, %v1242_v47   ;;  %v1530_v47 = vadd.s32 4294967264, %v1504_v59 }
 0x146   : > { %v2813_v8 = vsub.s32 %v1523_v53, %v3007_v9 }
 0x147   : > { %v2819_v54 = vsub.s32 %v1530_v47, %v3007_v9 }
 0x148   : > { %1450 = vperm.xlu0 %1844, %v845_v43   ;;  %v2806_v43 = vsub.s32 %v1516_v10, %v3007_v9 }
 0x149   : > { %1471 = vperm.xlu1 %1845, %v1108_v40  }
 0x14c   : > { %1492 = vperm.xlu0 %1844, %v1371_v61  }
 0x14d   : > { %1453 = vperm.xlu1 %1845, %v846_v30  }
 0x150   : > { %1474 = vperm.xlu0 %1844, %v1109_v39   ;;  %v1544_v39 = vadd.s32 4294967248, %v1504_v59 }
 0x151   : > { %1495 = vperm.xlu1 %1845, %v1372_v28  }
 0x152   : > { %v1547_v17 = vsub.s32 %v1544_v39, %v3007_v9 }
 0x154   : > { %1477 = vperm.xlu0 %1844, %v1110_v24  }
 0x155   : > { %1498 = vperm.xlu1 %1845, %v1373_v22  }
 0x158   : > { %1501 = vperm.xlu0 %1844, %v1374_v52   ;;  %v2840_v52 = vsub.s32 %v1551_v15, %v3007_v9 }
 0x195   : > { %v1412_v14 = vpop.permute.xlu1 %1411  ;;  %v1409_v57 = vpop.permute.xlu0 %1408 }
 0x196   : > { %v1513_v61 = vrot.slane %v1412_v14, %v2798_v41  ;;  %v1508_v12 = vrot.slane %v1409_v57, %v2801_v26 }
 0x198   : > { %v1515_v31 = vsel %vm1514_vm0, %v1513_v61, %v1508_v12 }
 0x19a   : > { %v1415_v3 = vpop.permute.xlu1 %1414 }
 0x19b   : > { %v1418_v13 = vpop.permute.xlu0 %1417  ;;  %v1520_v25 = vrot.slane %v1415_v3, %v2806_v43 }
 0x19c   : > { %v1527_v45 = vrot.slane %v1418_v13, %v2813_v8 }
 0x19d   : > { %v1522_v49 = vsel %vm1521_vm1, %v1520_v25, %v1515_v31 }
 0x19e   : > { %v1529_v24 = vsel %vm1528_vm2, %v1527_v45, %v1522_v49 }
 0x19f   : > { %v1421_v1 = vpop.permute.xlu1 %1420 }
 0x1a0   : > { %v2780_v11 = vpop.permute.xlu0 %1423  ;;  %v1534_v30 = vrot.slane %v1421_v1, %v2819_v54 }
 0x1a1   : > { %v1541_v60 = vrot.slane %v2780_v11, %v2824_v0 }
 0x1a2   : > { %v1536_v33 = vsel %vm1535_vm3, %v1534_v30, %v1529_v24 }
 0x1a3   : > { %v1543_v35 = vsel %vm1542_vm4, %v1541_v60, %v1536_v33 }
 0x1a4   : > { %v2782_v44 = vpop.permute.xlu1 %1426 }
 0x1a5   : > { %v2784_v63 = vpop.permute.xlu0 %1429 }
 0x1a8   : > { %v1433_v32 = vpop.permute.xlu1 %1432 }
 0x1a9   : > { %v1436_v48 = vpop.permute.xlu0 %1435  ;;  %v1561_v28 = vrot.slane %v1433_v32, %v2801_v26 }
 0x1aa   : > { %v1565_v20 = vrot.slane %v1436_v48, %v2798_v41  ;;  %v1548_v48 = vrot.slane %v2782_v44, %v1547_v17 }
 0x1ac   : > { %v1439_v5 = vpop.permute.xlu1 %1438  ;;  %v1566_v21 = vsel %vm1514_vm0, %v1565_v20, %v1561_v28 }
 0x1ad   : > { %v2786_v36 = vpop.permute.xlu0 %1441  ;;  %v1570_v27 = vrot.slane %v1439_v5, %v2806_v43  ;;  %v1555_v5 = vrot.slane %v2784_v63, %v2840_v52 }
 0x1ae   : > { %v1575_v46 = vrot.slane %v2786_v36, %v2813_v8 }
 0x1af   : > { %v1571_v62 = vsel %vm1521_vm1, %v1570_v27, %v1566_v21 }
 0x1b0   : > { %v2788_v29 = vpop.permute.xlu1 %1444 }
 0x1b1   : > { %v1580_v2 = vrot.slane %v2788_v29, %v2819_v54 }
 0x1b3   : > { %v1457_v58 = vpop.permute.xlu0 %1456 }
 0x1b4   : > { %v1460_v7 = vpop.permute.xlu1 %1459  ;;  %v1600_v38 = vrot.slane %v1457_v58, %v2801_v26  ;;  %v1576_v58 = vsel %vm1528_vm2, %v1575_v46, %v1571_v62 }
 0x1b5   : > { %v1604_v16 = vrot.slane %v1460_v7, %v2798_v41  ;;  %v1581_v10 = vsel %vm1535_vm3, %v1580_v2, %v1576_v58 }
 0x1b7   : > { %v2791_v23 = vpop.permute.xlu0 %1462  ;;  %v1605_v3 = vsel %vm1514_vm0, %v1604_v16, %v1600_v38 }
 0x1b8   : > { %v2793_v34 = vpop.permute.xlu1 %1480  ;;  %v1609_v14 = vrot.slane %v2791_v23, %v2806_v43 }
 0x1b9   : > { %v1639_v13 = vrot.slane %v2793_v34, %v2801_v26 }
 0x1ba   : > { %v1610_v23 = vsel %vm1521_vm1, %v1609_v14, %v1605_v3 }
 0x1bb   : > { %v2795_v55 = vpop.permute.xlu0 %1483 }
 0x1bc   : > { %v2803_v37 = vpop.permute.xlu1 %1465  ;;  %v1643_v1 = vrot.slane %v2795_v55, %v2798_v41 }
 0x1bd   : > { %v1614_v11 = vrot.slane %v2803_v37, %v2813_v8 }
 0x1be   : > { %v1644_v55 = vsel %vm1514_vm0, %v1643_v1, %v1639_v13 }
 0x1bf   : > { %v2808_v40 = vpop.permute.xlu0 %1486  ;;  %v1615_v9 = vsel %vm1528_vm2, %v1614_v11, %v1610_v23 }
 0x1c0   : > { %v2815_v42 = vpop.permute.xlu1 %1447  ;;  %v1648_v19 = vrot.slane %v2808_v40, %v2806_v43  ;;  %v1550_v40 = vsel %vm1549_vm5, %v1548_v48, %v1543_v35 }
 0x1c1   : > { %v1585_v36 = vrot.slane %v2815_v42, %v2824_v0 }
 0x1c2   : > { %v1649_v61 = vsel %vm1521_vm1, %v1648_v19, %v1644_v55 }
 0x1c3   : > { %v1469_v4 = vpop.permute.xlu0 %1468  ;;  %v1586_v53 = vsel %vm1542_vm4, %v1585_v36, %v1581_v10 }
 0x1c4   : > { %v2826_v51 = vpop.permute.xlu1 %1489  ;;  %v1619_v29 = vrot.slane %v1469_v4, %v2819_v54 }
 0x1c5   : > { %v1653_v44 = vrot.slane %v2826_v51, %v2813_v8  ;;  %v1557_v51 = vsel %vm1556_vm6, %v1555_v5, %v1550_v40 }
 0x1c6   : > { %v1620_v37 = vsel %vm1535_vm3, %v1619_v29, %v1615_v9 }
 0x1c7   : > { %v1451_v50 = vpop.permute.xlu0 %1450  ;;  %v1654_v56 = vsel %vm1528_vm2, %v1653_v44, %v1649_v61 }
 0x1c8   : > { %v1472_v6 = vpop.permute.xlu1 %1471  ;;  %v1590_v59 = vrot.slane %v1451_v50, %v1547_v17 }
 0x1c9   : > { %v1624_v7 = vrot.slane %v1472_v6, %v2824_v0 }
 0x1ca   : > { %v1591_v12 = vsel %vm1549_vm5, %v1590_v59, %v1586_v53 }
 0x1cb   : > { %v1493_v22 = vpop.permute.xlu0 %1492  ;;  %v1625_v8 = vsel %vm1542_vm4, %v1624_v7, %v1620_v37 }
 0x1cc   : > { %v1454_v57 = vpop.permute.xlu1 %1453  ;;  %v1658_v41 = vrot.slane %v1493_v22, %v2819_v54 }
 0x1cd   : > { %v1595_v63 = vrot.slane %v1454_v57, %v2840_v52 }
 0x1ce   : > { %v1659_v4 = vsel %vm1535_vm3, %v1658_v41, %v1654_v56 }
 0x1cf   : > { %v1475_v32 = vpop.permute.xlu0 %1474  ;;  %v1596_v42 = vsel %vm1556_vm6, %v1595_v63, %v1591_v12 }
 0x1d0   : > { %v1629_v18 = vrot.slane %v1475_v32, %v1547_v17  ;;  %v1496_v34 = vpop.permute.xlu1 %1495  ;;  %v1676_v50 = vsel %vm1675_vm7, %v1596_v42, %v1557_v51 }
 0x1d1   : > { %v1663_v43 = vrot.slane %v1496_v34, %v2824_v0 }
 0x1d2   : > { %v1630_v25 = vsel %vm1549_vm5, %v1629_v18, %v1625_v8 }
 0x1d3   : > { %v1478_v26 = vpop.permute.xlu0 %1477  ;;  %v1664_v49 = vsel %vm1542_vm4, %v1663_v43, %v1659_v4 }
 0x1d4   : > { %v1634_v47 = vrot.slane %v1478_v26, %v2840_v52  ;;  %v1499_v54 = vpop.permute.xlu1 %1498 }
 0x1d5   : > { %v1668_v45 = vrot.slane %v1499_v54, %v1547_v17 }
 0x1d6   : > { %v1635_v31 = vsel %vm1556_vm6, %v1634_v47, %v1630_v25 }
 0x1d7   : > { %v1502_v0 = vpop.permute.xlu0 %1501  ;;  %v1669_v39 = vsel %vm1549_vm5, %v1668_v45, %v1664_v49  ;;  %v1678_v15 = vsel %vm1677_vm8, %v1635_v31, %v1676_v50 }
 0x1d8   : > { %v1673_v30 = vrot.slane %v1502_v0, %v2840_v52 }
 0x1da   : > { %v1674_v28 = vsel %vm1556_vm6, %v1673_v30, %v1669_v39 }
 0x1db   : > { %v1680_v20 = vsel %vm1679_vm9, %v1674_v28, %v1678_v15 }
 0x1dc   : > { %v1683_v24 = vsel %vm1682_vm10, 0.0, %v1680_v20 }
 0x1dd   : > { %v1685_v60 = vsel %vm1684_vm11, %v1683_v24, 0.0 }
 0x1de   : > { %1687 = vst.msk [vmem:[%s134_s11] sm:$0xff] %vm1686_vm12, %v1685_v60 }
 0x1df   : > { %1889 = shalt.err (!%p1886_p2)
}
 0x1e0   : > { %s1890_s23 = scalar_lea.hbm %s2900_s20, 128  ;;  %s1894_s17 = scalar_lea.hbm %s2945_s1, 256 }
 0x1e1   : > { %p1891_p4 = scmp.ne.s32.totalorder %s2900_s20, %s1890_s23  ;;  %p1895_p9 = scmp.lt.u32.totalorder %s2900_s20, %s2945_s1 }
 0x1e2   : > { %p1896_p1 = scmp.lt.u32.totalorder %s1894_s17, %s1890_s23  ;;  %p1898_p6 = scmp.lt.u32.totalorder %s1890_s23, %s2900_s20 }
 0x1e3   : > { %p1892_p5 = pnand %p1891_p4, %p3008_p11 }
 0x1e4   : > { %p1897_p3 = por %p1896_p1, %p1895_p9 }
 0x1e5   : > { %p1893_p7 = pneg %p1892_p5 }
 0x1e6   : > { %p1899_p12 = por %p1898_p6, %p1897_p3 }
 0x1e8   : > { %p1900_p13 = pnand %p1899_p12, %p1893_p7 }
 0x1ea   : > { %1903 = shalt.err (!%p1900_p13)
}
 0x1eb   : > { %1788 = dma.vmem_to_hbm [thread:$0]  (%p3008_p11), %s2902_s13, 128, %s2900_s20, %s1689_s10  }
 0x1ec PF: > { %s1714_s29 = sand.u32 1, %s1930_s6   ;;  %p3009_p8 = scmp.ne.s32.totalorder %s2961_s19, 0 }
 0x1ed   : > { %p3010_p10 = scmp.ge.s32.totalorder %s1942_s9, 2  ;;  %s1715_s2 = scalar_lea.sflag [#allocation4], %s1714_s29 }
 0x1ef   : > { %p1795_p0 = pnand %p3010_p10, %p3009_p8 }
 0x1f1   : > { %1925 = dma.done.wait (!%p1795_p0), %s1715_s2, 128  }
 0x1f2   : > { %1927 = vsyncadd (!%p1795_p0), %s1715_s2, 4294967168  ;;  %p14_p2 = scmp.ge.s32.totalorder %s1993_s12, 4   ;;  %s3011_s6 = smov %s1934_s7 }
 0x1f3   : > { %s3012_s7 = smov %s1938_s8  ;;  %s3013_s8 = smov %s2005_s15 }
 0x1f4   : > { %s3014_s9 = smov %s1993_s12  ;;  %16 = sbr.rel (!%p14_p2) target bundleno = 5 (0x5), region = 69 }
 0x1fb   :  { %1720 = vsyncpa [#allocation3], 1 }
 0x1fc   :  { %1722 = vsyncpa [#allocation3 + $0x1], 1 }
 0x1fd   :  { %1723 = vsyncpa [#allocation4], 1 }
 0x1fe   :  { %1725 = vsyncpa [#allocation4 + $0x1], 1 }

</bundles_post_ra>
